<compile_context>
chip_gen: v5e
topology: v5e:2x2
jax: 0.10.0
libtpu: 0.0.40
codegen_flags: <defaults>
</compile_context>

<pallas_src>
import jax
import jax.numpy as jnp
from jax.experimental import pallas as pl
from jax.experimental.pallas import tpu as pltpu

HIDDEN = (20, 40, 80)   # fixed hidden widths from the PyTorch module
ROW_ALIGN = 16          # sublane granularity legal for both f32 and bf16 blocks


def _round_up(x, m):
    return (x + m - 1) // m * m


def qrdqn_kernel(x_ref, w1_ref, wh_ref, b_ref, o_ref):
    """One batch tile: 4 matmuls + 3 ReLUs.

    Hidden widths are zero-padded to 128 lanes; the output is stored at its
    true (num_actions*num_quants) width in o_ref's dtype.
    """
    cdt = w1_ref.dtype                      # MXU input dtype (f32 or bf16)
    out_dim = o_ref.shape[-1]
    b = b_ref[...]                          # (4, HPAD) f32 packed biases

    # Layer 1: (TB, num_inputs) @ (num_inputs, HPAD) -> ReLU
    h = jnp.dot(x_ref[...], w1_ref[...], preferred_element_type=jnp.float32)
    h = jnp.maximum(h + b[0:1, :], 0.0)
    # Layer 2: (TB, HPAD) @ (HPAD, HPAD) -> ReLU   (real block is 20x40)
    h = jnp.dot(h.astype(cdt), wh_ref[0], preferred_element_type=jnp.float32)
    h = jnp.maximum(h + b[1:2, :], 0.0)
    # Layer 3: (TB, HPAD) @ (HPAD, HPAD) -> ReLU   (real block is 40x80)
    h = jnp.dot(h.astype(cdt), wh_ref[1], preferred_element_type=jnp.float32)
    h = jnp.maximum(h + b[2:3, :], 0.0)
    # Output layer: (TB, HPAD) @ (HPAD, HPAD); keep only the real out_dim lanes.
    y = jnp.dot(h.astype(cdt), wh_ref[2], preferred_element_type=jnp.float32)
    o_ref[...] = (y[:, :out_dim] + b[3:4, :out_dim]).astype(o_ref.dtype)


def pack_params(params, num_inputs, out_dim, compute_dtype=jnp.bfloat16):
    """Zero-pad all layer widths to a 128-lane slab and pack into 3 operands."""
    (w1, b1), (w2, b2), (w3, b3), (w4, b4) = params
    hpad = max(128, _round_up(out_dim, 128))
    h1, h2, h3 = HIDDEN

    w1p = jnp.zeros((num_inputs, hpad), compute_dtype)
    w1p = w1p.at[:, :h1].set(w1.astype(compute_dtype))

    whp = jnp.zeros((3, hpad, hpad), compute_dtype)
    whp = whp.at[0, :h1, :h2].set(w2.astype(compute_dtype))
    whp = whp.at[1, :h2, :h3].set(w3.astype(compute_dtype))
    whp = whp.at[2, :h3, :out_dim].set(w4.astype(compute_dtype))

    bp = jnp.zeros((4, hpad), jnp.float32)
    bp = bp.at[0, :h1].set(b1.reshape(-1).astype(jnp.float32))
    bp = bp.at[1, :h2].set(b2.reshape(-1).astype(jnp.float32))
    bp = bp.at[2, :h3].set(b3.reshape(-1).astype(jnp.float32))
    bp = bp.at[3, :out_dim].set(b4.reshape(-1).astype(jnp.float32))
    return w1p, whp, bp


def qrdqn_forward(x, packed, num_actions, num_quants, *, block_batch=1024):
    """x: (batch, num_inputs) -> (batch, num_actions, num_quants) f32."""
    assert block_batch >= ROW_ALIGN
    w1p, whp, bp = packed
    batch, num_inputs = x.shape
    out_dim = num_actions * num_quants
    cdt = w1p.dtype

    # Cast x to the compute dtype up front (halves the x HBM read on bf16 path;
    # no-op on the f32 numerics path).
    x = x.astype(cdt)

    # Batch tiling: pad only to a 16-row group, fit tile_b so the last tile is
    # nearly full, and force an even number (>= 2) of grid steps when there is
    # enough work so both v7x TensorCores get a share.
    padded_rows = _round_up(batch, ROW_ALIGN)
    num_tiles = pl.cdiv(padded_rows, block_batch)
    if padded_rows >= 2 * ROW_ALIGN:
        num_tiles = max(num_tiles, 2)
        num_tiles += num_tiles % 2
    tile_b = _round_up(pl.cdiv(padded_rows, num_tiles), ROW_ALIGN)
    padded_batch = tile_b * num_tiles
    if padded_batch != batch:
        x = jnp.pad(x, ((0, padded_batch - batch), (0, 0)))

    flat = pl.pallas_call(
        qrdqn_kernel,
        out_shape=jax.ShapeDtypeStruct((padded_batch, out_dim), cdt),
        grid=(num_tiles,),
        in_specs=[
            pl.BlockSpec((tile_b, num_inputs), lambda i: (i, 0)),   # x (streamed)
            pl.BlockSpec(w1p.shape, lambda i: (0, 0)),              # W1 (resident)
            pl.BlockSpec(whp.shape, lambda i: (0, 0, 0)),           # W2..W4 (resident)
            pl.BlockSpec(bp.shape, lambda i: (0, 0)),               # biases (resident)
        ],
        out_specs=pl.BlockSpec((tile_b, out_dim), lambda i: (i, 0)),
        compiler_params=pltpu.CompilerParams(
            dimension_semantics=("parallel",),
            vmem_limit_bytes=32 * 1024 * 1024,   # portable to v7x's 64 MiB VMEM
        ),
    )(x, w1p, whp, bp)

    # Matches torch's x.view(batch_size, num_actions, num_quants).  Only a row
    # slice + tiny cast/reshape remain (no lane-slice pass over a padded slab).
    return flat[:batch].astype(jnp.float32).reshape(batch, num_actions, num_quants)


def init_params(key, num_inputs, num_actions, num_quants):
    """Deterministic synthetic init (PyTorch-Linear-like uniform ranges)."""
    dims = [num_inputs, *HIDDEN, num_actions * num_quants]
    params = []
    for i in range(4):
        fan_in, fan_out = dims[i], dims[i + 1]
        key, kw, kb = jax.random.split(key, 3)
        bound = 1.0 / jnp.sqrt(jnp.float32(fan_in))
        w = jax.random.uniform(kw, (fan_in, fan_out), jnp.float32, -bound, bound)
        b = jax.random.uniform(kb, (1, fan_out), jnp.float32, -bound, bound)
        params.append((w, b))
    return params


def reference_forward(x, params, num_actions, num_quants):
    """Plain-JAX f32 reference mirroring the PyTorch module semantics."""
    h = x
    for i, (w, b) in enumerate(params):
        h = h @ w + b
        if i < 3:
            h = jnp.maximum(h, 0.0)
    return h.reshape(x.shape[0], num_actions, num_quants)


if __name__ == "__main__":
    # FrozenLake: 16 one-hot states, 4 actions; 8 quantiles; batch=2.
    num_inputs, num_actions, num_quants = 16, 4, 8
    out_dim = num_actions * num_quants
    batch = 2

    key = jax.random.PRNGKey(0)
    key, kx = jax.random.split(key)
    x = jax.random.normal(kx, (batch, num_inputs), dtype=jnp.float32)
    params = init_params(key, num_inputs, num_actions, num_quants)
    ref = reference_forward(x, params, num_actions, num_quants)

    # f32 compute+store path: tight numerics check vs. the plain-JAX reference.
    packed_f32 = pack_params(params, num_inputs, out_dim, jnp.float32)
    out_f32 = jax.block_until_ready(
        qrdqn_forward(x, packed_f32, num_actions, num_quants))
    assert out_f32.shape == (batch, num_actions, num_quants)
    assert jnp.allclose(out_f32, ref, atol=1e-4, rtol=1e-4)

    # bf16 compute+store path (performance config): f32 accumulation, loose tol.
    packed_bf16 = pack_params(params, num_inputs, out_dim, jnp.bfloat16)
    out_bf16 = jax.block_until_ready(
        qrdqn_forward(x, packed_bf16, num_actions, num_quants))
    assert out_bf16.shape == (batch, num_actions, num_quants)
    assert jnp.allclose(out_bf16, ref, atol=5e-2, rtol=5e-2)

    # Larger batch with default tiling: 300 rows -> 2 grid steps of 160 rows.
    batch2 = 300
    key, kx2 = jax.random.split(key)
    x2 = jax.random.normal(kx2, (batch2, num_inputs), dtype=jnp.float32)
    ref2 = reference_forward(x2, params, num_actions, num_quants)
    out2 = jax.block_until_ready(
        qrdqn_forward(x2, packed_f32, num_actions, num_quants))
    assert out2.shape == (batch2, num_actions, num_quants)
    assert jnp.allclose(out2, ref2, atol=1e-4, rtol=1e-4)

    # Small block_batch forces a 4-step grid (multi-tile pipelining, bf16 path).
    out3 = jax.block_until_ready(
        qrdqn_forward(x2, packed_bf16, num_actions, num_quants, block_batch=128))
    assert out3.shape == (batch2, num_actions, num_quants)
    assert jnp.allclose(out3, ref2, atol=5e-2, rtol=5e-2)

    print("KERNEL_OK")
</pallas_src>

<mosaic_0001>
module attributes {stable_mosaic.version = 11 : i64} {
  func.func @qrdqn_kernel(%arg0: i32, %arg1: memref<16x16xf32, #tpu.memory_space<vmem>>, %arg2: memref<16x128xf32, #tpu.memory_space<vmem>>, %arg3: memref<3x128x128xf32, #tpu.memory_space<vmem>>, %arg4: memref<4x128xf32, #tpu.memory_space<vmem>>, %arg5: memref<16x32xf32, #tpu.memory_space<vmem>>) attributes {dimension_semantics = [#tpu.dimension_semantics<parallel>], iteration_bounds = array<i64: 1>, scalar_prefetch = 0 : i64, scratch_operands = 0 : i64, tpu.core_type = #tpu.core_type<tc>, window_params = [{transform_indices = @transform_0, window_bounds = array<i64: 16, 16>}, {pipeline_mode = #tpu.pipeline_mode<synchronous>, transform_indices = @transform_1, window_bounds = array<i64: 16, 128>}, {pipeline_mode = #tpu.pipeline_mode<synchronous>, transform_indices = @transform_2, window_bounds = array<i64: 3, 128, 128>}, {pipeline_mode = #tpu.pipeline_mode<synchronous>, transform_indices = @transform_3, window_bounds = array<i64: 4, 128>}, {transform_indices = @transform_4, window_bounds = array<i64: 16, 32>}]} {
    %c0 = arith.constant 0 : index
    %c0_0 = arith.constant 0 : index
    %0 = vector.load %arg4[%c0, %c0_0] : memref<4x128xf32, #tpu.memory_space<vmem>>, vector<4x128xf32>
    %c0_1 = arith.constant 0 : index
    %c0_2 = arith.constant 0 : index
    %1 = vector.load %arg1[%c0_1, %c0_2] : memref<16x16xf32, #tpu.memory_space<vmem>>, vector<16x16xf32>
    %c0_3 = arith.constant 0 : index
    %c0_4 = arith.constant 0 : index
    %2 = vector.load %arg2[%c0_3, %c0_4] : memref<16x128xf32, #tpu.memory_space<vmem>>, vector<16x128xf32>
    %cst = arith.constant dense<0.000000e+00> : vector<16x128xf32>
    %3 = tpu.matmul %1, %2, %cst {dimension_numbers = #tpu.dot_dimension_numbers<[1], [0], [0], [1], [0, 0, 1, 1], [], []>} : vector<16x16xf32>, vector<16x128xf32>, vector<16x128xf32> -> vector<16x128xf32>
    %4 = vector.extract_strided_slice %0 {offsets = [0, 0], sizes = [1, 128], strides = [1, 1]} : vector<4x128xf32> to vector<1x128xf32>
    %5 = vector.broadcast %4 : vector<1x128xf32> to vector<16x128xf32>
    %6 = arith.addf %3, %5 : vector<16x128xf32>
    %cst_5 = arith.constant 0.000000e+00 : f32
    %7 = vector.broadcast %cst_5 : f32 to vector<16x128xf32>
    %8 = arith.maximumf %6, %7 : vector<16x128xf32>
    %c0_6 = arith.constant 0 : index
    %c0_7 = arith.constant 0 : index
    %c0_8 = arith.constant 0 : index
    %9 = vector.load %arg3[%c0_6, %c0_7, %c0_8] : memref<3x128x128xf32, #tpu.memory_space<vmem>>, vector<1x128x128xf32>
    %10 = vector.shape_cast %9 : vector<1x128x128xf32> to vector<128x128xf32>
    %cst_9 = arith.constant dense<0.000000e+00> : vector<16x128xf32>
    %11 = tpu.matmul %8, %10, %cst_9 {dimension_numbers = #tpu.dot_dimension_numbers<[1], [0], [0], [1], [0, 0, 1, 1], [], []>} : vector<16x128xf32>, vector<128x128xf32>, vector<16x128xf32> -> vector<16x128xf32>
    %12 = vector.extract_strided_slice %0 {offsets = [1, 0], sizes = [1, 128], strides = [1, 1]} : vector<4x128xf32> to vector<1x128xf32>
    %13 = vector.broadcast %12 : vector<1x128xf32> to vector<16x128xf32>
    %14 = arith.addf %11, %13 : vector<16x128xf32>
    %cst_10 = arith.constant 0.000000e+00 : f32
    %15 = vector.broadcast %cst_10 : f32 to vector<16x128xf32>
    %16 = arith.maximumf %14, %15 : vector<16x128xf32>
    %c1 = arith.constant 1 : index
    %c0_11 = arith.constant 0 : index
    %c0_12 = arith.constant 0 : index
    %17 = vector.load %arg3[%c1, %c0_11, %c0_12] : memref<3x128x128xf32, #tpu.memory_space<vmem>>, vector<1x128x128xf32>
    %18 = vector.shape_cast %17 : vector<1x128x128xf32> to vector<128x128xf32>
    %cst_13 = arith.constant dense<0.000000e+00> : vector<16x128xf32>
    %19 = tpu.matmul %16, %18, %cst_13 {dimension_numbers = #tpu.dot_dimension_numbers<[1], [0], [0], [1], [0, 0, 1, 1], [], []>} : vector<16x128xf32>, vector<128x128xf32>, vector<16x128xf32> -> vector<16x128xf32>
    %20 = vector.extract_strided_slice %0 {offsets = [2, 0], sizes = [1, 128], strides = [1, 1]} : vector<4x128xf32> to vector<1x128xf32>
    %21 = vector.broadcast %20 : vector<1x128xf32> to vector<16x128xf32>
    %22 = arith.addf %19, %21 : vector<16x128xf32>
    %cst_14 = arith.constant 0.000000e+00 : f32
    %23 = vector.broadcast %cst_14 : f32 to vector<16x128xf32>
    %24 = arith.maximumf %22, %23 : vector<16x128xf32>
    %c2 = arith.constant 2 : index
    %c0_15 = arith.constant 0 : index
    %c0_16 = arith.constant 0 : index
    %25 = vector.load %arg3[%c2, %c0_15, %c0_16] : memref<3x128x128xf32, #tpu.memory_space<vmem>>, vector<1x128x128xf32>
    %26 = vector.shape_cast %25 : vector<1x128x128xf32> to vector<128x128xf32>
    %cst_17 = arith.constant dense<0.000000e+00> : vector<16x128xf32>
    %27 = tpu.matmul %24, %26, %cst_17 {dimension_numbers = #tpu.dot_dimension_numbers<[1], [0], [0], [1], [0, 0, 1, 1], [], []>} : vector<16x128xf32>, vector<128x128xf32>, vector<16x128xf32> -> vector<16x128xf32>
    %28 = vector.extract_strided_slice %27 {offsets = [0, 0], sizes = [16, 32], strides = [1, 1]} : vector<16x128xf32> to vector<16x32xf32>
    %29 = vector.extract_strided_slice %0 {offsets = [3, 0], sizes = [1, 32], strides = [1, 1]} : vector<4x128xf32> to vector<1x32xf32>
    %30 = vector.broadcast %29 : vector<1x32xf32> to vector<16x32xf32>
    %31 = arith.addf %28, %30 : vector<16x32xf32>
    %c0_18 = arith.constant 0 : index
    %c0_19 = arith.constant 0 : index
    %32 = vector.load %arg5[%c0_18, %c0_19] : memref<16x32xf32, #tpu.memory_space<vmem>>, vector<16x32xf32>
    tpu.vector_store %arg5[%c0_18, %c0_19], %31 {strides = array<i32>} : memref<16x32xf32, #tpu.memory_space<vmem>>, vector<16x32xf32>,
    return
  }
  func.func @transform_0(%arg0: i32) -> (i32, i32) {
    %c0_i32 = arith.constant 0 : i32
    %c0_i32_0 = arith.constant 0 : i32
    return %arg0, %c0_i32 : i32, i32
  }
  func.func @transform_1(%arg0: i32) -> (i32, i32) {
    %c0_i32 = arith.constant 0 : i32
    %c0_i32_0 = arith.constant 0 : i32
    %c0_i32_1 = arith.constant 0 : i32
    return %c0_i32, %c0_i32_0 : i32, i32
  }
  func.func @transform_2(%arg0: i32) -> (i32, i32, i32) {
    %c0_i32 = arith.constant 0 : i32
    %c0_i32_0 = arith.constant 0 : i32
    %c0_i32_1 = arith.constant 0 : i32
    %c0_i32_2 = arith.constant 0 : i32
    return %c0_i32, %c0_i32_0, %c0_i32_1 : i32, i32, i32
  }
  func.func @transform_3(%arg0: i32) -> (i32, i32) {
    %c0_i32 = arith.constant 0 : i32
    %c0_i32_0 = arith.constant 0 : i32
    %c0_i32_1 = arith.constant 0 : i32
    return %c0_i32, %c0_i32_0 : i32, i32
  }
  func.func @transform_4(%arg0: i32) -> (i32, i32) {
    %c0_i32 = arith.constant 0 : i32
    %c0_i32_0 = arith.constant 0 : i32
    return %arg0, %c0_i32 : i32, i32
  }
}

</mosaic_0001>

<bundles_post_ra>
// kernel: tpu_custom_call.1
= control target key start
LH: loop header
LB: loop body
LE: loop exit
PB: predicated region body
PF: predicated region fallthrough
CT: control target
= control target key end

     0   :  { %9 = vsyncpa [#allocation3], 0  ;;  %s489_s0 = inlined_call_operand.hbm [shape: f32[16,16], index: 0, kind: input, shape index: {}]   ;;  %s490_s1 = inlined_call_operand.hbm [shape: f32[16,128], index: 1, kind: input, shape index: {}]   ;;  %s491_s2 = inlined_call_operand.hbm [shape: f32[3,128,128], index: 2, kind: input, shape index: {}]   ;;  %s492_s3 = inlined_call_operand.hbm [shape: f32[4,128], index: 3, kind: input, shape index: {}]   ;;  %s493_s4 = inlined_call_operand.hbm [shape: f32[16,32], index: 4, kind: output, shape index: {}]  }
   0x1   :  { %10 = vsyncpa [#allocation6], 0 }
   0x2   :  { %11 = vsyncpa [#allocation9], 0 }
   0x3   :  { %12 = vsyncpa [#allocation4], 0  ;;  %s30_s17 = sshll.u32 %s490_s1, 4  ;;  %s422_s18 = smov [#allocation5]   ;;  %s31_s17 = int_to_ptr.hbm [resolvable:$true] %s30_s17 }
   0x4   :  { %s32_s19 = sshll.u32 %s422_s18, 4  ;;  %s17_s22 = sshll.u32 %s489_s0, 4  ;;  %s33_s19 = int_to_ptr.vmem [resolvable:$true] %s32_s19  ;;  %s18_s22 = int_to_ptr.hbm [resolvable:$true] %s17_s22 }
   0x5   :  { %s423_s23 = smov 128   ;;  %s424_s24 = smov 8  }
   0x6   :  { %38 = dma.hbm_to_vmem [thread:$0]  %s31_s17, 256, %s33_s19, [#allocation6], %s423_s23, %s423_s23, %s424_s24  }
   0x7   :  { %s425_s25 = smov [#allocation2]   ;;  %s43_s1 = sshll.u32 %s491_s2, 4  ;;  %s44_s1 = int_to_ptr.hbm [resolvable:$true] %s43_s1 }
   0x8   :  { %s19_s26 = sshll.u32 %s425_s25, 4  ;;  %s57_s30 = sshll.u32 %s492_s3, 4  ;;  %s20_s26 = int_to_ptr.vmem [resolvable:$true] %s19_s26  ;;  %s58_s30 = int_to_ptr.hbm [resolvable:$true] %s57_s30 }
   0x9   :  { %25 = dma.hbm_to_vmem [thread:$0]  %s18_s22, 256, %s20_s26, [#allocation3], %s423_s23, %s423_s23, %s424_s24  }
   0xa   :  { %s426_s5 = smov [#allocation7]   ;;  %s427_s7 = smov [#allocation8]  }
   0xb   :  { %s45_s6 = sshll.u32 %s426_s5, 4  ;;  %s59_s2 = sshll.u32 %s427_s7, 4  ;;  %s46_s6 = int_to_ptr.vmem [resolvable:$true] %s45_s6  ;;  %s60_s2 = int_to_ptr.vmem [resolvable:$true] %s59_s2 }
   0xc   :  { %51 = dma.hbm_to_vmem [thread:$0]  %s44_s1, 6144, %s46_s6, [#allocation6], %s423_s23, %s423_s23, %s424_s24  }
   0xd   :  { %62 = dma.hbm_to_vmem [thread:$0]  %s58_s30, 64, %s60_s2, [#allocation9]  }
   0xe   :  { %414 = dma.done.wait [#allocation3], 256  }
   0xf   :  { %415 = vsyncadd [#allocation3], 4294967040 }
  0x10   :  { %416 = dma.done.wait [#allocation6], 6400  }
  0x11   :  { %417 = vsyncadd [#allocation6], 4294960896 }
  0x12   :  { %418 = dma.done.wait [#allocation9], 64  }
  0x13   :  { %419 = vsyncadd [#allocation9], 4294967232  ;;  %v83_v0 = vld [vmem:[#allocation5 + $0x8] sm:$0xff]  ;;  %v82_v1 = vld [vmem:[#allocation5] sm:$0xff]  ;;  %vm85_vm0 = vcmask 130048   ;;  %vm245_vm1 = vcmask 261120  }
  0x14   :  { %106 = vmatpush.msra.mxu0 %v83_v0  ;;  %v80_v2 = vld [vmem:[#allocation2] sm:$0xff]  ;;  %v132_v3 = vld [vmem:[#allocation7 + $0x78] sm:$0xff]  ;;  %v131_v4 = vld [vmem:[#allocation7 + $0x70] sm:$0xff]  ;;  %s428_s3 = smov [#allocation10]   ;;  %s254_s11 = sshll.u32 %s493_s4, 4  ;;  %s255_s11 = int_to_ptr.hbm [resolvable:$true] %s254_s11 }
  0x15   :  { %271 = vmatpush.msra.mxu1 %v132_v3  ;;  %v130_v5 = vld [vmem:[#allocation7 + $0x68] sm:$0xff]  ;;  %v129_v6 = vld [vmem:[#allocation7 + $0x60] sm:$0xff]  ;;  %v128_v8 = vld [vmem:[#allocation7 + $0x58] sm:$0xff]  ;;  %s252_s8 = sshll.u32 %s428_s3, 4  ;;  %s253_s8 = int_to_ptr.vmem [resolvable:$true] %s252_s8 }
  0x16   :  { %107 = vmatpush.msra.mxu0 %v82_v1  ;;  %v81_v7 = vld [vmem:[#allocation2 + $0x8] sm:$0xff]  ;;  %v127_v9 = vld [vmem:[#allocation7 + $0x50] sm:$0xff]  ;;  %v125_v11 = vld [vmem:[#allocation7 + $0x40] sm:$0xff] }
  0x17   :  { %269 = vmatmul.msk.f32.vlgmr.msra.gmra.mxu0 %vm85_vm0, %v80_v2  ;;  %272 = vmatpush.msra.mxu1 %v131_v4  ;;  %v126_v10 = vld [vmem:[#allocation7 + $0x48] sm:$0xff]  ;;  %v124_v12 = vld [vmem:[#allocation7 + $0x38] sm:$0xff]  ;;  %v123_v13 = vld [vmem:[#allocation7 + $0x30] sm:$0xff] }
  0x18   :  { %134 = vmatpush.msrb.mxu0 %v132_v3  ;;  %v122_v14 = vld [vmem:[#allocation7 + $0x28] sm:$0xff]  ;;  %v121_v15 = vld [vmem:[#allocation7 + $0x20] sm:$0xff]  ;;  %v120_v16 = vld [vmem:[#allocation7 + $0x18] sm:$0xff] }
  0x19   :  { %273 = vmatpush.msra.mxu1 %v130_v5  ;;  %v119_v17 = vld [vmem:[#allocation7 + $0x10] sm:$0xff]  ;;  %v118_v18 = vld [vmem:[#allocation7 + $0x8] sm:$0xff]  ;;  %v117_v19 = vld [vmem:[#allocation7] sm:$0xff] }
  0x1a   :  { %135 = vmatpush.msrb.mxu0 %v131_v4  ;;  %v175_v20 = vld [vmem:[#allocation7 + $0xf8] sm:$0xff]  ;;  %v174_v21 = vld [vmem:[#allocation7 + $0xf0] sm:$0xff]  ;;  %v173_v22 = vld [vmem:[#allocation7 + $0xe8] sm:$0xff] }
  0x1b   :  { %274 = vmatpush.msra.mxu1 %v129_v6  ;;  %177 = vmatpush.msra.mxu2 %v175_v20  ;;  %v172_v23 = vld [vmem:[#allocation7 + $0xe0] sm:$0xff]  ;;  %v171_v24 = vld [vmem:[#allocation7 + $0xd8] sm:$0xff]  ;;  %v170_v25 = vld [vmem:[#allocation7 + $0xd0] sm:$0xff] }
  0x1c   :  { %136 = vmatpush.msrb.mxu0 %v130_v5  ;;  %v169_v26 = vld [vmem:[#allocation7 + $0xc8] sm:$0xff]  ;;  %v168_v27 = vld [vmem:[#allocation7 + $0xc0] sm:$0xff]  ;;  %v167_v29 = vld [vmem:[#allocation7 + $0xb8] sm:$0xff] }
  0x1d   :  { %275 = vmatpush.msra.mxu1 %v128_v8  ;;  %178 = vmatpush.msra.mxu2 %v174_v21  ;;  %v477_v28 = vld [vmem:[#allocation8] sm:$0xf]  ;;  %v166_v31 = vld [vmem:[#allocation7 + $0xb0] sm:$0xff]  ;;  %v165_v32 = vld [vmem:[#allocation7 + $0xa8] sm:$0xff] }
  0x1e   :  { %137 = vmatpush.msrb.mxu0 %v129_v6  ;;  %v84_v30 = vperm.slane %v477_v28, 0  ;;  %v164_v35 = vld [vmem:[#allocation7 + $0xa0] sm:$0xff]  ;;  %v163_v37 = vld [vmem:[#allocation7 + $0x98] sm:$0xff]  ;;  %v162_v41 = vld [vmem:[#allocation7 + $0x90] sm:$0xff]  ;;  %v133_v53 = vperm.slane %v477_v28, 1  ;;  %v176_v3 = vperm.slane %v477_v28, 2 }
  0x1f   :  { %270 = vmatmul.msk.f32.gmra.mxu0 %vm85_vm0, %v81_v7  ;;  %276 = vmatpush.msra.mxu1 %v127_v9  ;;  %v161_v42 = vld [vmem:[#allocation7 + $0x88] sm:$0xff]  ;;  %v160_v43 = vld [vmem:[#allocation7 + $0x80] sm:$0xff]  ;;  %v218_v44 = vld [vmem:[#allocation7 + $0x178] sm:$0xff] }
  0x20   :  { %138 = vmatpush.msrb.mxu0 %v128_v8  ;;  %179 = vmatpush.msra.mxu2 %v173_v22  ;;  %v217_v45 = vld [vmem:[#allocation7 + $0x170] sm:$0xff]  ;;  %v216_v46 = vld [vmem:[#allocation7 + $0x168] sm:$0xff]  ;;  %v215_v47 = vld [vmem:[#allocation7 + $0x160] sm:$0xff] }
  0x21   :  { %277 = vmatpush.msra.mxu1 %v126_v10  ;;  %219 = vmatpush.msra.mxu3 %v218_v44  ;;  %v214_v48 = vld [vmem:[#allocation7 + $0x158] sm:$0xff]  ;;  %v213_v49 = vld [vmem:[#allocation7 + $0x150] sm:$0xff]  ;;  %v212_v50 = vld [vmem:[#allocation7 + $0x148] sm:$0xff] }
  0x22   :  { %139 = vmatpush.msrb.mxu0 %v127_v9  ;;  %180 = vmatpush.msra.mxu2 %v172_v23  ;;  %v211_v51 = vld [vmem:[#allocation7 + $0x140] sm:$0xff]  ;;  %v210_v52 = vld [vmem:[#allocation7 + $0x138] sm:$0xff]  ;;  %v209_v54 = vld [vmem:[#allocation7 + $0x130] sm:$0xff] }
  0x23   :  { %278 = vmatpush.msra.mxu1 %v125_v11  ;;  %220 = vmatpush.msra.mxu3 %v217_v45  ;;  %v208_v55 = vld [vmem:[#allocation7 + $0x128] sm:$0xff]  ;;  %v207_v58 = vld [vmem:[#allocation7 + $0x120] sm:$0xff]  ;;  %v206_v60 = vld [vmem:[#allocation7 + $0x118] sm:$0xff] }
  0x24   :  { %140 = vmatpush.msrb.mxu0 %v126_v10  ;;  %181 = vmatpush.msra.mxu2 %v171_v24  ;;  %v205_v0 = vld [vmem:[#allocation7 + $0x110] sm:$0xff]  ;;  %v204_v1 = vld [vmem:[#allocation7 + $0x108] sm:$0xff]  ;;  %v203_v2 = vld [vmem:[#allocation7 + $0x100] sm:$0xff]  ;;  %v242_v10 = vperm.slane %v477_v28, 3 }
  0x25   :  { %279 = vmatpush.msra.mxu1 %v124_v12  ;;  %221 = vmatpush.msra.mxu3 %v216_v46 }
  0x26   :  { %141 = vmatpush.msrb.mxu0 %v125_v11  ;;  %182 = vmatpush.msra.mxu2 %v170_v25 }
  0x27   :  { %280 = vmatpush.msra.mxu1 %v123_v13  ;;  %222 = vmatpush.msra.mxu3 %v215_v47 }
  0x28   :  { %142 = vmatpush.msrb.mxu0 %v124_v12  ;;  %183 = vmatpush.msra.mxu2 %v169_v26 }
  0x29   :  { %281 = vmatpush.msra.mxu1 %v122_v14  ;;  %223 = vmatpush.msra.mxu3 %v214_v48 }
  0x2a   :  { %143 = vmatpush.msrb.mxu0 %v123_v13  ;;  %184 = vmatpush.msra.mxu2 %v168_v27 }
  0x2b   :  { %282 = vmatpush.msra.mxu1 %v121_v15  ;;  %224 = vmatpush.msra.mxu3 %v213_v49 }
  0x2c   :  { %144 = vmatpush.msrb.mxu0 %v122_v14  ;;  %185 = vmatpush.msra.mxu2 %v167_v29 }
  0x2d   :  { %283 = vmatpush.msra.mxu1 %v120_v16  ;;  %225 = vmatpush.msra.mxu3 %v212_v50 }
  0x2e   :  { %145 = vmatpush.msrb.mxu0 %v121_v15  ;;  %186 = vmatpush.msra.mxu2 %v166_v31 }
  0x2f   :  { %284 = vmatpush.msra.mxu1 %v119_v17  ;;  %226 = vmatpush.msra.mxu3 %v211_v51 }
  0x30   :  { %146 = vmatpush.msrb.mxu0 %v120_v16  ;;  %187 = vmatpush.msra.mxu2 %v165_v32 }
  0x31   :  { %285 = vmatpush.msra.mxu1 %v118_v18  ;;  %227 = vmatpush.msra.mxu3 %v210_v52 }
  0x32   :  { %147 = vmatpush.msrb.mxu0 %v119_v17  ;;  %188 = vmatpush.msra.mxu2 %v164_v35 }
  0x33   :  { %286 = vmatpush.msra.mxu1 %v117_v19  ;;  %228 = vmatpush.msra.mxu3 %v209_v54 }
  0x34   :  { %148 = vmatpush.msrb.mxu0 %v118_v18  ;;  %189 = vmatpush.msra.mxu2 %v163_v37 }
  0x35   :  { %229 = vmatpush.msra.mxu3 %v208_v55 }
  0x36   :  { %149 = vmatpush.msrb.mxu0 %v117_v19  ;;  %190 = vmatpush.msra.mxu2 %v162_v41 }
  0x37   :  { %230 = vmatpush.msra.mxu3 %v207_v58 }
  0x38   :  { %191 = vmatpush.msra.mxu2 %v161_v42 }
  0x39   :  { %231 = vmatpush.msra.mxu3 %v206_v60 }
  0x3a   :  { %192 = vmatpush.msra.mxu2 %v160_v43 }
  0x3b   :  { %232 = vmatpush.msra.mxu3 %v205_v0 }
  0x3d   :  { %233 = vmatpush.msra.mxu3 %v204_v1 }
  0x3f   :  { %234 = vmatpush.msra.mxu3 %v203_v2 }
  0x94   :  { %v109_v33 = vpop.f32.mrf.mxu0 }
  0x95   :  { %v110_v34 = vadd.f32 %v109_v33, %v84_v30 }
  0x97   :  { %v115_v36 = vmax.f32 %v110_v34, 0.0 }
  0x99   :  { %150 = vmatmul.f32.vlgmr.msrb.gmra.mxu0 %v115_v36 }
  0x9c   :  { %v112_v38 = vpop.f32.mrf.mxu0 }
  0x9d   :  { %v113_v39 = vadd.f32 %v112_v38, %v84_v30 }
  0x9f   :  { %v116_v40 = vmax.f32 %v113_v39, 0.0 }
  0xa1   :  { %153 = vmatmul.f32.vlgmr.msra.gmra.mxu1 %v116_v40 }
 0x116   :  { %v151_v56 = vpop.f32.mrf.mxu0 }
 0x117   :  { %v152_v57 = vadd.f32 %v151_v56, %v133_v53 }
 0x119   :  { %v157_v59 = vmax.f32 %v152_v57, 0.0 }
 0x11b   :  { %193 = vmatmul.f32.vlgmr.msra.gmra.mxu2 %v157_v59 }
 0x11e   :  { %v154_v61 = vpop.f32.mrf.mxu1 }
 0x11f   :  { %v155_v62 = vadd.f32 %v154_v61, %v133_v53 }
 0x121   :  { %v158_v63 = vmax.f32 %v155_v62, 0.0 }
 0x123   :  { %196 = vmatmul.f32.gmra.mxu2 %v158_v63 }
 0x19e   :  { %v194_v4 = vpop.f32.mrf.mxu2 }
 0x19f   :  { %v195_v5 = vadd.f32 %v194_v4, %v176_v3 }
 0x1a1   :  { %v200_v6 = vmax.f32 %v195_v5, 0.0 }
 0x1a3   :  { %235 = vmatmul.f32.vlgmr.msra.gmra.mxu3 %v200_v6 }
 0x1a6   :  { %v197_v7 = vpop.f32.mrf.mxu2 }
 0x1a7   :  { %v198_v8 = vadd.f32 %v197_v7, %v176_v3 }
 0x1a9   :  { %v201_v9 = vmax.f32 %v198_v8, 0.0 }
 0x1ab   :  { %238 = vmatmul.f32.gmra.mxu3 %v201_v9 }
 0x226   :  { %v236_v11 = vpop.f32.mrf.mxu3 }
 0x227   :  { %v243_v12 = vadd.f32 %v242_v10, %v236_v11 }
 0x229   :  { %246 = vst.msk [vmem:[#allocation10] sm:$0xff] %vm245_vm1, %v243_v12 }
 0x22e   :  { %v239_v13 = vpop.f32.mrf.mxu3 }
 0x22f   :  { %v244_v14 = vadd.f32 %v242_v10, %v239_v13 }
 0x231   :  { %247 = vst.msk [vmem:[#allocation10 + $0x8] sm:$0xff] %vm245_vm1, %v244_v14 }
 0x232   :  { %260 = dma.vmem_to_hbm [thread:$0]  %s253_s8, 256, %s255_s11, [#allocation4], %s423_s23, %s423_s23, %s424_s24  }
 0x233   :  { %420 = dma.done.wait [#allocation4], 256  }
 0x234   :  { %421 = vsyncadd [#allocation4], 4294967040 }
 0x235   :  { %265 = vsyncpa [#allocation3], 1 }
 0x236   :  { %266 = vsyncpa [#allocation6], 1 }
 0x237   :  { %267 = vsyncpa [#allocation9], 1 }
 0x238   :  { %268 = vsyncpa [#allocation4], 1 }

</bundles_post_ra>
